<compile_context>
chip_gen: v6e
topology: v6e:2x2x1
jax: 0.10.0
libtpu: 0.0.40
codegen_flags: <defaults>
</compile_context>

<pallas_src>
import functools

import jax
import jax.numpy as jnp
from jax.experimental import pallas as pl
from jax.experimental.pallas import tpu as pltpu


def _round_up(x, m):
    return ((x + m - 1) // m) * m


def _default_tm():
    """512 on small-VMEM chips (v7x: 64 MiB/TC), 1024 on v5e/v6e (128 MiB)."""
    try:
        info = pltpu.get_tpu_info()
        vmem = getattr(info, "vmem_capacity_bytes", None)
        if vmem is not None and vmem <= (64 << 20):
            return 512
        return 1024
    except Exception:
        return 512


def _select_tm(m, tm_max):
    """Pick an M-tile: multiple of 8, <= tm_max, preferring exact divisors of M
    (no ragged last block / no activation padding) and an even number of grid
    steps (even split across v7x's two TensorCores)."""
    cap = max(8, min(_round_up(tm_max, 8), _round_up(m, 8)))
    if m > 16:  # keep >= 2 grid steps when M allows
        cap = min(cap, max(8, _round_up(pl.cdiv(m, 2), 8)))
    best_div = None
    for cand in range(cap, 7, -8):
        if m % cand == 0:
            steps = m // cand
            if steps == 1 or steps % 2 == 0:
                return cand
            if best_div is None:
                best_div = cand
    if best_div is not None:
        return best_div
    return cap  # fall back to a ragged (cdiv) grid with a masked last block


def _conv1x1_bn_relu_kernel(x_ref, w_ref, shift_ref, o_ref, *, relu):
    # x_ref:     (tm, Cin_eff)       compute-dtype tile of flattened NHWC pixels
    # w_ref:     (Cin_eff, Cout_pad) BN-scale-folded weight
    # shift_ref: (1, Cout_pad)       f32 folded BN shift
    # o_ref:     (tm, Cout_pad)
    acc = jnp.dot(x_ref[...], w_ref[...], preferred_element_type=jnp.float32)
    y = acc + shift_ref[...]
    if relu:
        y = jnp.maximum(y, 0.0)
    o_ref[...] = y.astype(o_ref.dtype)


def fold_conv1x1_bn(weight, bn_params=None, *, cin_pad=None,
                    compute_dtype=jnp.bfloat16):
    """Fold eval-mode BatchNorm into a 1x1-conv weight (do ONCE at model load).

    weight:  (Cout, Cin) or (Cout, Cin, 1, 1), groups=1.
    cin_pad: pad the input-channel dim to this size; pass the previous layer's
             Cout_pad to consume its padded output channels directly.
    Returns (w_folded (Cin_eff, Cout_pad) in compute_dtype,
             shift    (1, Cout_pad) f32,
             cout).
    Padded output columns have zero weight and zero shift, so padded output
    channels are exactly zero after ReLU (safe to carry into the next layer).
    """
    cout, cin = weight.shape[0], weight.shape[1]
    w = weight.reshape(cout, cin).astype(jnp.float32).T  # (Cin, Cout)
    if bn_params is not None:
        scale = bn_params["gamma"] / jnp.sqrt(bn_params["running_var"] + bn_params["eps"])
        shift = bn_params["beta"] - bn_params["running_mean"] * scale
        w = w * scale[None, :]
    else:
        shift = jnp.zeros((cout,), jnp.float32)
    cout_pad = _round_up(cout, 128)  # lane-dense (unmasked) output stores
    cin_eff = cin if cin_pad is None else cin_pad
    assert cin_eff >= cin, (cin_eff, cin)
    w = jnp.pad(w, ((0, cin_eff - cin), (0, cout_pad - cout)))
    shift = jnp.pad(shift, (0, cout_pad - cout)).reshape(1, cout_pad)
    return w.astype(compute_dtype), shift.astype(jnp.float32), cout


def conv1x1_bn_relu_nhwc(x_flat, w_folded, shift, *, cout=None, relu=True,
                         out_dtype=None, tm=None, keep_padded_cout=False):
    """Fused 1x1-conv + BN(eval) + ReLU on flattened NHWC pixels (fast path).

    x_flat:   (M, Cin_eff) flattened pixels (M = N*H*W), ideally already in
              w_folded.dtype (bf16) so no cast pass is needed.
    w_folded: (Cin_eff, Cout_pad) from fold_conv1x1_bn().
    shift:    (1, Cout_pad) f32.
    Returns (M, Cout_pad) if keep_padded_cout else (M, cout), in out_dtype
    (default: x_flat.dtype; pass bf16 when the consumer is another bf16 layer).
    """
    m, cin_eff = x_flat.shape
    assert w_folded.shape[0] == cin_eff, (w_folded.shape, x_flat.shape)
    cout_pad = w_folded.shape[1]
    if out_dtype is None:
        out_dtype = x_flat.dtype
    if x_flat.dtype != w_folded.dtype:
        # Fast-path callers keep activations in the compute dtype end-to-end,
        # so this extra HBM pass never happens when chaining layers.
        x_flat = x_flat.astype(w_folded.dtype)

    if tm is None:
        tm = _default_tm()
    tm_eff = _select_tm(m, tm)
    grid = (pl.cdiv(m, tm_eff),)

    # VMEM budget: double-buffered x / out tiles, weight + shift (constant index
    # map, but 2 buffers are still allocated), the (tm, cout_pad) f32 acc+shift
    # intermediate, plus headroom.  Narrow Cin is lane-padded to 128 in VMEM.
    cin_lane = _round_up(cin_eff, 128)
    in_isz = jnp.dtype(w_folded.dtype).itemsize
    out_isz = jnp.dtype(out_dtype).itemsize
    vmem_bytes = (2 * tm_eff * cin_lane * in_isz        # x double buffer
                  + 2 * tm_eff * cout_pad * out_isz     # out double buffer
                  + 2 * cin_lane * cout_pad * in_isz    # weight (2 bufs alloc'd)
                  + 2 * 8 * cout_pad * 4                # shift (sublane-padded)
                  + tm_eff * cout_pad * 4               # f32 acc+shift temp
                  + (2 << 20))                          # headroom
    vmem_bytes = int(min(max(vmem_bytes, 32 << 20), 48 << 20))

    # NOTE: weight/shift index maps are constant so Pallas skips re-DMA across
    # grid steps; pl.Buffered(1) would also drop their second VMEM buffer but
    # is left off for lowering compatibility.
    out = pl.pallas_call(
        functools.partial(_conv1x1_bn_relu_kernel, relu=relu),
        out_shape=jax.ShapeDtypeStruct((m, cout_pad), out_dtype),
        grid_spec=pltpu.PrefetchScalarGridSpec(
            num_scalar_prefetch=0,
            grid=grid,
            in_specs=[
                pl.BlockSpec((tm_eff, cin_eff), lambda i: (i, 0)),
                pl.BlockSpec((cin_eff, cout_pad), lambda i: (0, 0)),
                pl.BlockSpec((1, cout_pad), lambda i: (0, 0)),
            ],
            out_specs=pl.BlockSpec((tm_eff, cout_pad), lambda i: (i, 0)),
        ),
        compiler_params=pltpu.CompilerParams(
            dimension_semantics=("parallel",),
            vmem_limit_bytes=vmem_bytes,
        ),
    )(x_flat, w_folded, shift)

    if keep_padded_cout or cout is None or cout == cout_pad:
        return out
    return out[:, :cout]


def conv1x1_bn_relu(x_nchw, weight, bn_params=None, *, stride=1, relu=True,
                    tm=None, compute_dtype=jnp.bfloat16):
    """PyTorch-parity entry point (NCHW in / NCHW out), matching OSNet's
    Conv1x1.forward in eval mode: conv1x1(bias=False, stride) -> BN -> ReLU.

    For performance, call fold_conv1x1_bn() once at model load and
    conv1x1_bn_relu_nhwc() with NHWC bf16 activations end-to-end (see __main__);
    this wrapper's transpose / cast / channel-slice each cost an extra HBM pass.
    """
    n, cin, h, w = x_nchw.shape
    cout = weight.shape[0]
    if stride != 1:
        # TODO(synk): fold the spatial subsample into the producer layer or an
        # NHWC BlockSpec index_map instead of this extra XLA gather over HBM.
        x_nchw = x_nchw[:, :, ::stride, ::stride]
    hs, ws = x_nchw.shape[2], x_nchw.shape[3]
    w_folded, shift, _ = fold_conv1x1_bn(weight, bn_params,
                                         compute_dtype=compute_dtype)
    x_flat = jnp.transpose(x_nchw, (0, 2, 3, 1)).reshape(n * hs * ws, cin)
    out_flat = conv1x1_bn_relu_nhwc(x_flat, w_folded, shift, cout=cout,
                                    relu=relu, out_dtype=x_nchw.dtype, tm=tm)
    return jnp.transpose(out_flat.reshape(n, hs, ws, cout), (0, 3, 1, 2))


if __name__ == "__main__":
    key = jax.random.PRNGKey(0)
    keys = jax.random.split(key, 11)

    N, Cin, H, W = 2, 4, 16, 16
    C1, C2 = 8, 8  # two stacked Conv1x1 blocks (OSNet pool2/pool3/conv5 style)

    def make_bn(kg, kb, km, kv, c):
        return dict(
            gamma=jax.random.normal(kg, (c,), jnp.float32) * 0.1 + 1.0,
            beta=jax.random.normal(kb, (c,), jnp.float32) * 0.1,
            running_mean=jax.random.normal(km, (c,), jnp.float32) * 0.1,
            running_var=jax.nn.softplus(jax.random.normal(kv, (c,), jnp.float32)) + 0.5,
            eps=1e-5,
        )

    x = jax.random.normal(keys[0], (N, Cin, H, W), dtype=jnp.float32)
    w1 = jax.random.normal(keys[1], (C1, Cin, 1, 1), dtype=jnp.float32) * 0.1
    bn1 = make_bn(keys[2], keys[3], keys[4], keys[5], C1)
    w2 = jax.random.normal(keys[6], (C2, C1, 1, 1), dtype=jnp.float32) * 0.1
    bn2 = make_bn(keys[7], keys[8], keys[9], keys[10], C2)

    # Pure-JAX f32 reference of Conv1x1.forward (conv1x1 + eval-mode BN + ReLU).
    def ref_conv1x1(x_nchw, wt, bn):
        c_out, c_in = wt.shape[:2]
        y = jnp.einsum("nchw,oc->nohw", x_nchw, wt.reshape(c_out, c_in))
        sc = bn["gamma"] / jnp.sqrt(bn["running_var"] + bn["eps"])
        sh = bn["beta"] - bn["running_mean"] * sc
        return jnp.maximum(y * sc[None, :, None, None] + sh[None, :, None, None], 0.0)

    ref1 = ref_conv1x1(x, w1, bn1)
    ref2 = ref_conv1x1(ref1, w2, bn2)

    # --- 1) PyTorch-parity path (NCHW in / NCHW out) -------------------------
    out1 = jax.block_until_ready(conv1x1_bn_relu(x, w1, bn1, stride=1))
    assert out1.shape == ref1.shape, (out1.shape, ref1.shape)
    err1 = float(jnp.max(jnp.abs(out1 - ref1)))
    assert jnp.allclose(out1, ref1, atol=3e-2, rtol=3e-2), err1

    # --- 2) Fast path: NHWC + bf16 end-to-end, padded channels carried -------
    # Weight folding / padding / bf16 cast done once ("model load" time).
    w1f, s1, _ = fold_conv1x1_bn(w1, bn1)
    w2f, s2, cout2 = fold_conv1x1_bn(w2, bn2, cin_pad=w1f.shape[1])

    # Single NCHW->NHWC + bf16 conversion at the network input only.
    x_flat = jnp.transpose(x, (0, 2, 3, 1)).reshape(N * H * W, Cin).astype(jnp.bfloat16)
    h1 = conv1x1_bn_relu_nhwc(x_flat, w1f, s1, out_dtype=jnp.bfloat16,
                              keep_padded_cout=True)            # (M, 128), bf16
    h2 = conv1x1_bn_relu_nhwc(h1, w2f, s2, cout=cout2,
                              out_dtype=jnp.bfloat16)           # (M, C2), bf16
    out2 = jax.block_until_ready(
        jnp.transpose(h2.reshape(N, H, W, cout2), (0, 3, 1, 2)).astype(jnp.float32))
    assert out2.shape == ref2.shape, (out2.shape, ref2.shape)
    err2 = float(jnp.max(jnp.abs(out2 - ref2)))
    assert jnp.allclose(out2, ref2, atol=5e-2, rtol=5e-2), err2

    print("KERNEL_OK")
</pallas_src>

<mosaic_0001>
module attributes {stable_mosaic.version = 11 : i64} {
  func.func @_conv1x1_bn_relu_kernel(%arg0: i32, %arg1: memref<256x4xbf16, #tpu.memory_space<vmem>>, %arg2: memref<4x128xbf16, #tpu.memory_space<vmem>>, %arg3: memref<1x128xf32, #tpu.memory_space<vmem>>, %arg4: memref<256x128xf32, #tpu.memory_space<vmem>>) attributes {dimension_semantics = [#tpu.dimension_semantics<parallel>], iteration_bounds = array<i64: 2>, scalar_prefetch = 0 : i64, scratch_operands = 0 : i64, tpu.core_type = #tpu.core_type<tc>, window_params = [{transform_indices = @transform_0, window_bounds = array<i64: 256, 4>}, {pipeline_mode = #tpu.pipeline_mode<synchronous>, transform_indices = @transform_1, window_bounds = array<i64: 4, 128>}, {pipeline_mode = #tpu.pipeline_mode<synchronous>, transform_indices = @transform_2, window_bounds = array<i64: 1, 128>}, {transform_indices = @transform_3, window_bounds = array<i64: 256, 128>}]} {
    %c0 = arith.constant 0 : index
    %c0_0 = arith.constant 0 : index
    %0 = vector.load %arg1[%c0, %c0_0] : memref<256x4xbf16, #tpu.memory_space<vmem>>, vector<256x4xbf16>
    %c0_1 = arith.constant 0 : index
    %c0_2 = arith.constant 0 : index
    %1 = vector.load %arg2[%c0_1, %c0_2] : memref<4x128xbf16, #tpu.memory_space<vmem>>, vector<4x128xbf16>
    %cst = arith.constant dense<0.000000e+00> : vector<256x128xf32>
    %2 = tpu.matmul %0, %1, %cst {dimension_numbers = #tpu.dot_dimension_numbers<[1], [0], [0], [1], [0, 0, 1, 1], [], []>} : vector<256x4xbf16>, vector<4x128xbf16>, vector<256x128xf32> -> vector<256x128xf32>
    %c0_3 = arith.constant 0 : index
    %c0_4 = arith.constant 0 : index
    %3 = vector.load %arg3[%c0_3, %c0_4] : memref<1x128xf32, #tpu.memory_space<vmem>>, vector<1x128xf32>
    %4 = vector.broadcast %3 : vector<1x128xf32> to vector<256x128xf32>
    %5 = arith.addf %2, %4 : vector<256x128xf32>
    %cst_5 = arith.constant 0.000000e+00 : f32
    %6 = vector.broadcast %cst_5 : f32 to vector<256x128xf32>
    %7 = arith.maximumf %5, %6 : vector<256x128xf32>
    %c0_6 = arith.constant 0 : index
    %c0_7 = arith.constant 0 : index
    %8 = vector.load %arg4[%c0_6, %c0_7] : memref<256x128xf32, #tpu.memory_space<vmem>>, vector<256x128xf32>
    tpu.vector_store %arg4[%c0_6, %c0_7], %7 {strides = array<i32>} : memref<256x128xf32, #tpu.memory_space<vmem>>, vector<256x128xf32>,
    return
  }
  func.func @transform_0(%arg0: i32) -> (i32, i32) {
    %c0_i32 = arith.constant 0 : i32
    %c0_i32_0 = arith.constant 0 : i32
    return %arg0, %c0_i32 : i32, i32
  }
  func.func @transform_1(%arg0: i32) -> (i32, i32) {
    %c0_i32 = arith.constant 0 : i32
    %c0_i32_0 = arith.constant 0 : i32
    %c0_i32_1 = arith.constant 0 : i32
    return %c0_i32, %c0_i32_0 : i32, i32
  }
  func.func @transform_2(%arg0: i32) -> (i32, i32) {
    %c0_i32 = arith.constant 0 : i32
    %c0_i32_0 = arith.constant 0 : i32
    %c0_i32_1 = arith.constant 0 : i32
    return %c0_i32, %c0_i32_0 : i32, i32
  }
  func.func @transform_3(%arg0: i32) -> (i32, i32) {
    %c0_i32 = arith.constant 0 : i32
    %c0_i32_0 = arith.constant 0 : i32
    return %arg0, %c0_i32 : i32, i32
  }
}

</mosaic_0001>

<bundles_post_ra>
// kernel: tpu_custom_call.1
= control target key start
LH: loop header
LB: loop body
LE: loop exit
PB: predicated region body
PF: predicated region fallthrough
CT: control target
= control target key end

     0   :  { %8 = vsyncpa [#allocation3], 0  ;;  %s1104_s0 = inlined_call_operand.vmem [shape: bf16[512,4], index: 0, kind: input, shape index: {}]   ;;  %s1105_s1 = inlined_call_operand.vmem [shape: bf16[4,128], index: 1, kind: input, shape index: {}]   ;;  %s1106_s2 = inlined_call_operand.vmem [shape: f32[1,128], index: 2, kind: input, shape index: {}]   ;;  %s1107_s3 = inlined_call_operand.hbm [shape: f32[512,128], index: 3, kind: output, shape index: {}]  }
   0x1   :  { %10 = vsyncpa [#allocation3 + $0x1], 0  ;;  %s890_s12 = smov 0   ;;  %s892_s13 = smov 0  }
   0x2   :  { %s894_s14 = smov 0   ;;  %s896_s15 = smov 0  }
   0x3 LB: > { %s911_s16 = sadd.s32 4294967295, %s865_s15   ;;  %s647_s17 = sadd.s32 4294967294, %s865_s15   ;;  %s865_s15 = sphi %s896_s15, %s1113_s15   ;;  %s861_s14 = sphi %s894_s14, %s1112_s14   ;;  %s857_s13 = sphi %s892_s13, %s1111_s13   ;;  %s853_s12 = sphi %s890_s12, %s1110_s12  }
   0x4   : > { %s915_s18 = sadd.s32 1, %s865_s15   ;;  %s91_s19 = sadd.s32 1, %s861_s14 }
   0x5   : > { %s88_s20 = ssub.s32 %s865_s15, %s915_s18  ;;  %p101_p0 = scmp.ne.s32.totalorder %s861_s14, %s857_s13 }
   0x6   : > { %p89_p1 = scmp.eq.s32.totalorder %s88_s20, 0  ;;  %p102_p2 = scmp.eq.s32.totalorder %s911_s16, 1 }
   0x7   : > { %p107_p3 = scmp.ne.s32.totalorder %s857_s13, %s853_s12  ;;  %p108_p4 = scmp.eq.s32.totalorder %s647_s17, 1 }
   0x8   : > { %s926_s21 = scalar_select %p89_p1, %s861_s14, %s91_s19  }
   0x9   : > { %p928_p5 = por %p102_p2, %p101_p0  ;;  %p932_p6 = por %p108_p4, %p107_p3 }
   0xa   : > { %p650_p7 = scmp.ge.s32.totalorder %s865_s15, 1  ;;  %p141_p8 = scmp.lt.s32.totalorder %s865_s15, 3 }
   0xc   : > { %p142_p9 = pnand %p650_p7, %p141_p8 }
   0xd   : > { %s652_s26 = sshll.u32 (!%p142_p9), %s911_s16, 5  ;;  %s162_s4 = sand.u32 (!%p142_p9), 1, %s857_s13  }
   0xe   : > { %145 = sbr.rel (%p142_p9) target bundleno = 266 (0x10a), region = 32  ;;  %p166_p10 = scmp.lt.s32.totalorder (!%p142_p9), %s652_s26, 63 }
   0xf   : > { %s651_s7 = sshll.u32 (!%p142_p9), %s162_s4, 8  ;;  %s692_s9 = sshll.u32 (!%p142_p9), %s911_s16, 12 }
  0x10   : > { %s991_s8 = scalar_lea.vmem (!%p142_p9), [#allocation2], %s651_s7  ;;  %s1055_s19 = scalar_lea.hbm (!%p142_p9), %s1107_s3, %s692_s9 }
  0x11   : > { %s585_s10 = sshll.u32 (!%p142_p9), %s991_s8, 4  ;;  %s1064_s16 = scalar_lea.sflag (!%p142_p9), [#allocation3], %s162_s4  ;;  %s1057_s10 = int_to_ptr.vmem [resolvable:$true] %s585_s10 }
  0x12   : > { %s805_s20 = scalar_lea.vmem (!%p142_p9), %s1057_s10, 4096  ;;  %s867_s24 = smov (!%p142_p9), [#allocation2]  }
  0x13   : > { %v205_v0 = vld [vmem:[%s1105_s1] sm:$0x3]  ;;  %vm342_vm0 = vcmask 1041408   ;;  %s1115_s26 = smov (!%p166_p10, %s652_s26), 63  ;;  %vm293_vm1 = vcmask 31744   ;;  %p806_p11 = scmp.ne.s32.totalorder %s1057_s10, %s805_s20 }
  0x14   : > { %746 = vmatprep.subr.msk.bf16.mxu0 %vm342_vm0, %v205_v0  ;;  %747 = vmatprep.subr.msk.bf16.mxu1 %vm342_vm0, %v205_v0  ;;  %v344_v1 = vsel %vm342_vm0, %v205_v0, 0  ;;  %s653_s27 = sshll.u32 %s1115_s26, 2  ;;  %v983_v18 = vld [vmem:[%s1106_s2] ss:$0 sm:$0xff]  ;;  %s809_s25 = sshll.u32 %s867_s24, 4  ;;  %s810_s25 = int_to_ptr.vmem [resolvable:$false] %s809_s25 }
  0x15   : > { %711 = vmatpush3.bf16.msra.mxu0 %v344_v1  ;;  %745 = vmatpush3.bf16.msra.mxu1 %v344_v1  ;;  %s945_s30 = scalar_lea.vmem %s1104_s0, %s653_s27  ;;  %p807_p12 = pnand %p806_p11, %p928_p5 }
  0x16   : > { %v789_v2 = vld [vmem:[%s945_s30] sm:$0xff]   ;;  %v791_v4 = vld [vmem:[%s945_s30 + $0x8] sm:$0xff]   ;;  %v793_v6 = vld [vmem:[%s945_s30 + $0x10] sm:$0xff]   ;;  %s811_s26 = scalar_lea.vmem %s810_s25, 8192  ;;  %p812_p0 = scmp.lt.s32.totalorder %s1057_s10, %s810_s25 }
  0x17   : > { %v790_v3 = vld [vmem:[%s945_s30 + $0x40] sm:$0xff]   ;;  %712 = vmatprep.mubr.msk.bf16.mxu0 %vm293_vm1, %v789_v2  ;;  %v792_v5 = vld [vmem:[%s945_s30 + $0x48] sm:$0xff]   ;;  %v794_v7 = vld [vmem:[%s945_s30 + $0x50] sm:$0xff]   ;;  %p808_p13 = pneg %p807_p12  ;;  %p813_p1 = scmp.lt.s32.totalorder %s811_s26, %s805_s20 }
  0x18   : > { %728 = vmatprep.mubr.msk.bf16.mxu1 %vm293_vm1, %v790_v3  ;;  %713 = vmatmul.mubr.msk.bf16.vlgmr.msra.gmra.mxu0 %vm293_vm1, %v791_v4  ;;  %v795_v8 = vld [vmem:[%s945_s30 + $0x18] sm:$0xff]   ;;  %v797_v10 = vld [vmem:[%s945_s30 + $0x20] sm:$0xff]   ;;  %v799_v12 = vld [vmem:[%s945_s30 + $0x28] sm:$0xff]  }
  0x19   : > { %729 = vmatmul.mubr.msk.bf16.vlgmr.msra.gmra.mxu1 %vm293_vm1, %v792_v5  ;;  %716 = vmatprep.mubr.msk.bf16.mxu0 %vm293_vm1, %v793_v6  ;;  %v796_v9 = vld [vmem:[%s945_s30 + $0x58] sm:$0xff]   ;;  %v798_v11 = vld [vmem:[%s945_s30 + $0x60] sm:$0xff]   ;;  %v800_v13 = vld [vmem:[%s945_s30 + $0x68] sm:$0xff]   ;;  %p814_p2 = por %p813_p1, %p812_p0 }
  0x1a   : > { %732 = vmatprep.mubr.msk.bf16.mxu1 %vm293_vm1, %v794_v7  ;;  %v801_v14 = vld [vmem:[%s945_s30 + $0x30] sm:$0xff]   ;;  %v803_v16 = vld [vmem:[%s945_s30 + $0x38] sm:$0xff]  }
  0x1b   : > { %v802_v15 = vld [vmem:[%s945_s30 + $0x70] sm:$0xff]   ;;  %v804_v17 = vld [vmem:[%s945_s30 + $0x78] sm:$0xff]   ;;  %p815_p3 = pnand %p814_p2, %p808_p13 }
  0x20   : > { %717 = vmatmul.mubr.msk.bf16.gmra.mxu0 %vm293_vm1, %v795_v8 }
  0x21   : > { %733 = vmatmul.mubr.msk.bf16.gmra.mxu1 %vm293_vm1, %v796_v9  ;;  %720 = vmatprep.mubr.msk.bf16.mxu0 %vm293_vm1, %v797_v10 }
  0x22   : > { %736 = vmatprep.mubr.msk.bf16.mxu1 %vm293_vm1, %v798_v11 }
  0x28   : > { %721 = vmatmul.mubr.msk.bf16.gmra.mxu0 %vm293_vm1, %v799_v12 }
  0x29   : > { %737 = vmatmul.mubr.msk.bf16.gmra.mxu1 %vm293_vm1, %v800_v13  ;;  %724 = vmatprep.mubr.msk.bf16.mxu0 %vm293_vm1, %v801_v14 }
  0x2a   : > { %740 = vmatprep.mubr.msk.bf16.mxu1 %vm293_vm1, %v802_v15 }
  0x30   : > { %725 = vmatmul.mubr.msk.bf16.gmra.mxu0 %vm293_vm1, %v803_v16 }
  0x31   : > { %741 = vmatmul.mubr.msk.bf16.gmra.mxu1 %vm293_vm1, %v804_v17 }
  0xd8   : > { %v714_v19 = vpop.f32.mrf.mxu0 }
  0xd9   : > { %v389_v20 = vadd.f32 %v714_v19, %v983_v18  ;;  %v730_v21 = vpop.f32.mrf.mxu1 }
  0xda   : > { %v453_v22 = vadd.f32 %v730_v21, %v983_v18  ;;  %v380_v23 = vpop.f32.mrf.mxu0 }
  0xdb   : > { %v509_v24 = vmax.f32 %v389_v20, 0.0  ;;  %v381_v25 = vadd.f32 %v983_v18, %v380_v23  ;;  %v444_v26 = vpop.f32.mrf.mxu1 }
  0xdc   : > { %v525_v27 = vmax.f32 %v453_v22, 0.0  ;;  %v445_v28 = vadd.f32 %v983_v18, %v444_v26  ;;  %v715_v29 = vpop.f32.mrf.mxu0 }
  0xdd   : > { %541 = vst [vmem:[%s991_s8 + $0x10] sm:$0xff] %v509_v24  ;;  %v507_v30 = vmax.f32 %v381_v25, 0.0  ;;  %v392_v31 = vadd.f32 %v715_v29, %v983_v18  ;;  %v731_v32 = vpop.f32.mrf.mxu1 }
  0xde   : > { %557 = vst [vmem:[%s991_s8 + $0x90] sm:$0xff] %v525_v27  ;;  %v523_v33 = vmax.f32 %v445_v28, 0.0  ;;  %v456_v34 = vadd.f32 %v731_v32, %v983_v18  ;;  %v383_v35 = vpop.f32.mrf.mxu0 }
  0xdf   : > { %539 = vst [vmem:[%s991_s8] sm:$0xff] %v507_v30  ;;  %v510_v36 = vmax.f32 %v392_v31, 0.0  ;;  %v384_v37 = vadd.f32 %v983_v18, %v383_v35  ;;  %v447_v38 = vpop.f32.mrf.mxu1 }
  0xe0   : > { %555 = vst [vmem:[%s991_s8 + $0x80] sm:$0xff] %v523_v33  ;;  %v526_v39 = vmax.f32 %v456_v34, 0.0  ;;  %v448_v40 = vadd.f32 %v983_v18, %v447_v38  ;;  %v718_v41 = vpop.f32.mrf.mxu0 }
  0xe1   : > { %542 = vst [vmem:[%s991_s8 + $0x18] sm:$0xff] %v510_v36  ;;  %v508_v42 = vmax.f32 %v384_v37, 0.0  ;;  %v405_v43 = vadd.f32 %v718_v41, %v983_v18  ;;  %v734_v44 = vpop.f32.mrf.mxu1 }
  0xe2   : > { %558 = vst [vmem:[%s991_s8 + $0x98] sm:$0xff] %v526_v39  ;;  %v524_v45 = vmax.f32 %v448_v40, 0.0  ;;  %v469_v46 = vadd.f32 %v734_v44, %v983_v18  ;;  %v396_v47 = vpop.f32.mrf.mxu0 }
  0xe3   : > { %540 = vst [vmem:[%s991_s8 + $0x8] sm:$0xff] %v508_v42  ;;  %v513_v48 = vmax.f32 %v405_v43, 0.0  ;;  %v397_v49 = vadd.f32 %v983_v18, %v396_v47  ;;  %v460_v50 = vpop.f32.mrf.mxu1 }
  0xe4   : > { %556 = vst [vmem:[%s991_s8 + $0x88] sm:$0xff] %v524_v45  ;;  %v529_v51 = vmax.f32 %v469_v46, 0.0  ;;  %v461_v52 = vadd.f32 %v983_v18, %v460_v50  ;;  %v719_v53 = vpop.f32.mrf.mxu0 }
  0xe5   : > { %545 = vst [vmem:[%s991_s8 + $0x30] sm:$0xff] %v513_v48  ;;  %v511_v54 = vmax.f32 %v397_v49, 0.0  ;;  %v408_v55 = vadd.f32 %v719_v53, %v983_v18  ;;  %v735_v56 = vpop.f32.mrf.mxu1 }
  0xe6   : > { %561 = vst [vmem:[%s991_s8 + $0xb0] sm:$0xff] %v529_v51  ;;  %v527_v57 = vmax.f32 %v461_v52, 0.0  ;;  %v472_v58 = vadd.f32 %v735_v56, %v983_v18  ;;  %v399_v59 = vpop.f32.mrf.mxu0 }
  0xe7   : > { %543 = vst [vmem:[%s991_s8 + $0x20] sm:$0xff] %v511_v54  ;;  %v514_v60 = vmax.f32 %v408_v55, 0.0  ;;  %v400_v61 = vadd.f32 %v983_v18, %v399_v59  ;;  %v463_v62 = vpop.f32.mrf.mxu1 }
  0xe8   : > { %559 = vst [vmem:[%s991_s8 + $0xa0] sm:$0xff] %v527_v57  ;;  %v530_v63 = vmax.f32 %v472_v58, 0.0  ;;  %v464_v0 = vadd.f32 %v983_v18, %v463_v62  ;;  %v722_v1 = vpop.f32.mrf.mxu0 }
  0xe9   : > { %546 = vst [vmem:[%s991_s8 + $0x38] sm:$0xff] %v514_v60  ;;  %v512_v2 = vmax.f32 %v400_v61, 0.0  ;;  %v421_v3 = vadd.f32 %v722_v1, %v983_v18  ;;  %v738_v4 = vpop.f32.mrf.mxu1 }
  0xea   : > { %562 = vst [vmem:[%s991_s8 + $0xb8] sm:$0xff] %v530_v63  ;;  %v528_v5 = vmax.f32 %v464_v0, 0.0  ;;  %v485_v6 = vadd.f32 %v738_v4, %v983_v18  ;;  %v412_v7 = vpop.f32.mrf.mxu0 }
  0xeb   : > { %544 = vst [vmem:[%s991_s8 + $0x28] sm:$0xff] %v512_v2  ;;  %v517_v8 = vmax.f32 %v421_v3, 0.0  ;;  %v413_v9 = vadd.f32 %v983_v18, %v412_v7  ;;  %v476_v10 = vpop.f32.mrf.mxu1 }
  0xec   : > { %560 = vst [vmem:[%s991_s8 + $0xa8] sm:$0xff] %v528_v5  ;;  %v533_v11 = vmax.f32 %v485_v6, 0.0  ;;  %v477_v12 = vadd.f32 %v983_v18, %v476_v10  ;;  %v723_v13 = vpop.f32.mrf.mxu0 }
  0xed   : > { %549 = vst [vmem:[%s991_s8 + $0x50] sm:$0xff] %v517_v8  ;;  %v515_v14 = vmax.f32 %v413_v9, 0.0  ;;  %v424_v15 = vadd.f32 %v723_v13, %v983_v18  ;;  %v739_v16 = vpop.f32.mrf.mxu1 }
  0xee   : > { %565 = vst [vmem:[%s991_s8 + $0xd0] sm:$0xff] %v533_v11  ;;  %v531_v17 = vmax.f32 %v477_v12, 0.0  ;;  %v488_v19 = vadd.f32 %v739_v16, %v983_v18  ;;  %v415_v20 = vpop.f32.mrf.mxu0 }
  0xef   : > { %547 = vst [vmem:[%s991_s8 + $0x40] sm:$0xff] %v515_v14  ;;  %v518_v21 = vmax.f32 %v424_v15, 0.0  ;;  %v416_v22 = vadd.f32 %v983_v18, %v415_v20  ;;  %v479_v23 = vpop.f32.mrf.mxu1 }
  0xf0   : > { %563 = vst [vmem:[%s991_s8 + $0xc0] sm:$0xff] %v531_v17  ;;  %v534_v24 = vmax.f32 %v488_v19, 0.0  ;;  %v480_v25 = vadd.f32 %v983_v18, %v479_v23  ;;  %v726_v26 = vpop.f32.mrf.mxu0 }
  0xf1   : > { %550 = vst [vmem:[%s991_s8 + $0x58] sm:$0xff] %v518_v21  ;;  %v516_v27 = vmax.f32 %v416_v22, 0.0  ;;  %v437_v28 = vadd.f32 %v726_v26, %v983_v18  ;;  %v742_v29 = vpop.f32.mrf.mxu1 }
  0xf2   : > { %566 = vst [vmem:[%s991_s8 + $0xd8] sm:$0xff] %v534_v24  ;;  %v532_v30 = vmax.f32 %v480_v25, 0.0  ;;  %v501_v31 = vadd.f32 %v742_v29, %v983_v18  ;;  %v428_v32 = vpop.f32.mrf.mxu0 }
  0xf3   : > { %548 = vst [vmem:[%s991_s8 + $0x48] sm:$0xff] %v516_v27  ;;  %v521_v33 = vmax.f32 %v437_v28, 0.0  ;;  %v429_v34 = vadd.f32 %v983_v18, %v428_v32  ;;  %v492_v35 = vpop.f32.mrf.mxu1 }
  0xf4   : > { %564 = vst [vmem:[%s991_s8 + $0xc8] sm:$0xff] %v532_v30  ;;  %v537_v36 = vmax.f32 %v501_v31, 0.0  ;;  %v493_v37 = vadd.f32 %v983_v18, %v492_v35  ;;  %v727_v38 = vpop.f32.mrf.mxu0 }
  0xf5   : > { %553 = vst [vmem:[%s991_s8 + $0x70] sm:$0xff] %v521_v33  ;;  %v519_v39 = vmax.f32 %v429_v34, 0.0  ;;  %v440_v40 = vadd.f32 %v727_v38, %v983_v18  ;;  %v743_v41 = vpop.f32.mrf.mxu1 }
  0xf6   : > { %569 = vst [vmem:[%s991_s8 + $0xf0] sm:$0xff] %v537_v36  ;;  %v535_v42 = vmax.f32 %v493_v37, 0.0  ;;  %v504_v43 = vadd.f32 %v743_v41, %v983_v18  ;;  %v431_v44 = vpop.f32.mrf.mxu0 }
  0xf7   : > { %551 = vst [vmem:[%s991_s8 + $0x60] sm:$0xff] %v519_v39  ;;  %v522_v45 = vmax.f32 %v440_v40, 0.0  ;;  %v432_v46 = vadd.f32 %v983_v18, %v431_v44  ;;  %v495_v47 = vpop.f32.mrf.mxu1 }
  0xf8   : > { %567 = vst [vmem:[%s991_s8 + $0xe0] sm:$0xff] %v535_v42  ;;  %v538_v48 = vmax.f32 %v504_v43, 0.0  ;;  %v496_v49 = vadd.f32 %v983_v18, %v495_v47 }
  0xf9   : > { %554 = vst [vmem:[%s991_s8 + $0x78] sm:$0xff] %v522_v45  ;;  %v520_v50 = vmax.f32 %v432_v46, 0.0 }
  0xfa   : > { %570 = vst [vmem:[%s991_s8 + $0xf8] sm:$0xff] %v538_v48  ;;  %v536_v51 = vmax.f32 %v496_v49, 0.0 }
  0xfb   : > { %552 = vst [vmem:[%s991_s8 + $0x68] sm:$0xff] %v520_v50 }
  0xfc   : > { %568 = vst [vmem:[%s991_s8 + $0xe8] sm:$0xff] %v536_v51 }
  0xfd   : > { %818 = shalt.err (!%p815_p3)
}
  0xfe   : > { %s819_s27 = scalar_lea.hbm %s1055_s19, 4096  ;;  %s823_s30 = scalar_lea.hbm %s1107_s3, 8192 }
  0xff   : > { %p820_p4 = scmp.ne.s32.totalorder %s1055_s19, %s819_s27  ;;  %p824_p9 = scmp.lt.s32.totalorder %s1055_s19, %s1107_s3 }
 0x100   : > { %p825_p10 = scmp.lt.s32.totalorder %s823_s30, %s819_s27 }
 0x101   : > { %p821_p7 = pnand %p820_p4, %p928_p5 }
 0x102   : > { %p826_p11 = por %p825_p10, %p824_p9 }
 0x103   : > { %p822_p8 = pneg %p821_p7 }
 0x105   : > { %p827_p12 = pnand %p826_p11, %p822_p8 }
 0x107   : > { %830 = shalt.err (!%p827_p12)
}
 0x108   : > { %s868_s6 = smov 128   ;;  %s869_s7 = smov 8  }
 0x109   : > { %748 = dma.vmem_to_hbm [thread:$0]  (%p928_p5), %s1057_s10, 4096, %s1055_s19, %s1064_s16, %s868_s6, %s868_s6, %s869_s7  }
 0x10a PF: > { %p754_p13 = scmp.ge.s32.totalorder %s865_s15, 2  ;;  %s600_s8 = sand.u32 1, %s853_s12  }
 0x10b   : > { %s601_s9 = scalar_lea.sflag [#allocation3], %s600_s8 }
 0x10c   : > { %p751_p0 = pnand %p754_p13, %p932_p6 }
 0x10e   : > { %p752_p1 = pneg %p751_p0 }
 0x110   : > { %848 = dma.done.wait (%p752_p1), %s601_s9, 4096  }
 0x111   : > { %850 = vsyncadd (%p752_p1), %s601_s9, 4294963200  ;;  %p13_p2 = scmp.ge.s32.totalorder %s915_s18, 4   ;;  %s1110_s12 = smov %s857_s13 }
 0x112   : > { %s1111_s13 = smov %s861_s14  ;;  %s1112_s14 = smov %s926_s21 }
 0x113   : > { %s1113_s15 = smov %s915_s18  ;;  %15 = sbr.rel (!%p13_p2) target bundleno = 3 (0x3), region = 67 }
 0x118   :  { %606 = vsyncpa [#allocation3], 1 }
 0x119   :  { %608 = vsyncpa [#allocation3 + $0x1], 1 }

</bundles_post_ra>
